<compile_context>
chip_gen: v7x
topology: tpu7x:2x2x1
jax: 0.10.0
libtpu: 0.0.40
codegen_flags: <defaults>
</compile_context>

<pallas_src>
import functools

import jax
import jax.numpy as jnp
from jax.experimental import pallas as pl
from jax.experimental.pallas import tpu as pltpu


def _make_linevul_kernel(with_loss: bool):
    """Build the kernel body; `with_loss` is a static Python flag."""

    def kernel(*refs):
        if with_loss:
            (ids_ref, emb_ref, wd_ref, bd_ref, wc_ref, bc_ref, lab_ref,
             prob_ref, ll_ref, pooled_acc, denom_acc) = refs
        else:
            (ids_ref, emb_ref, wd_ref, bd_ref, wc_ref, bc_ref,
             prob_ref, pooled_acc, denom_acc) = refs
            lab_ref = None
            ll_ref = None

        s = pl.program_id(1)

        @pl.when(s == 0)
        def _init():
            pooled_acc[...] = jnp.zeros_like(pooled_acc)
            denom_acc[...] = jnp.zeros_like(denom_acc)

        # attention_mask = input_ids.ne(1)   (RoBERTa pad id == 1)
        ids = ids_ref[...]                                   # [tB, tS] int32
        mask = (ids != 1).astype(jnp.float32)                # [tB, tS] f32

        emb = emb_ref[...]                                   # [tB, tS, H] bf16

        # Masked pooled-sum of this sequence tile on the MXU:
        #   pooled_acc[b, :] += sum_s mask[b, s] * emb[b, s, :]
        # mask is exactly 0/1 so the bf16 cast is lossless; accumulate f32.
        mask_mm = mask.astype(emb.dtype)[:, None, :]         # [tB, 1, tS]
        partial = jnp.einsum('bqs,bsh->bqh', mask_mm, emb,
                             preferred_element_type=jnp.float32)
        pooled_acc[...] += partial[:, 0, :]                  # [tB, H] f32
        denom_acc[...] += jnp.sum(mask, axis=1, keepdims=True)

        @pl.when(s == pl.num_programs(1) - 1)
        def _epilogue():
            # Guard against all-pad rows (reference would produce NaN there;
            # no change on any row containing at least one real token).
            denom = jnp.maximum(denom_acc[...], 1.0)         # [tB, 1]
            pooled = pooled_acc[...] / denom                 # [tB, H] f32

            # pooler-style dense + tanh, then classifier head (MXU, bf16 in /
            # f32 accumulate; elementwise stays f32 for v5e friendliness).
            h = jnp.tanh(
                jnp.dot(pooled.astype(wd_ref.dtype), wd_ref[...],
                        preferred_element_type=jnp.float32) + bd_ref[...])
            logits = (jnp.dot(h.astype(wc_ref.dtype), wc_ref[...],
                              preferred_element_type=jnp.float32)
                      + bc_ref[...])                         # [tB, C]

            prob = jax.nn.sigmoid(logits)
            prob_ref[...] = prob

            if with_loss:
                y = lab_ref[...]                             # [tB, 1] f32
                p0 = prob[:, 0:1]                            # [tB, 1]
                ll_ref[...] = (jnp.log(p0 + 1e-10) * y
                               + jnp.log((1.0 - p0) + 1e-10) * (1.0 - y))

    return kernel


def linevul_forward(input_ids, labels, emb_table, w_dense, b_dense,
                    w_cls, b_cls, *, tile_b=8, tile_s=512,
                    stream_dtype=jnp.bfloat16, vmem_limit_bytes=None):
    """Pallas forward.  Returns prob, or (loss, prob) when labels is given.

    tile_b/tile_s default to a v7x-safe footprint (tB=8, tS=512, H<=768 bf16
    ~= 6.3 MiB per emb buffer, ~13 MiB double-buffered).  On v6e/v5e pass
    larger tiles plus vmem_limit_bytes (e.g. 64<<20) to amortize per-step
    overhead.
    """
    B, S = input_ids.shape
    H = emb_table.shape[1]
    C = w_cls.shape[1]

    tb = min(tile_b, B)
    assert B % tb == 0, "batch must be divisible by the batch tile"
    ts = min(tile_s, S)
    s_pad = (-S) % ts
    if s_pad:
        # pad id == 1 is masked out inside the kernel, so padding is inert.
        input_ids = jnp.pad(input_ids, ((0, 0), (0, s_pad)), constant_values=1)
    Sp = S + s_pad

    # Embedding gather (plain-JAX glue); stream the result in bf16.
    emb = jnp.take(emb_table.astype(stream_dtype), input_ids, axis=0)  # [B,Sp,H]

    wd = w_dense.astype(stream_dtype)                    # [H, H]
    wc = w_cls.astype(stream_dtype)                      # [H, C]
    bd = b_dense.reshape(1, H).astype(jnp.float32)
    bc = b_cls.reshape(1, C).astype(jnp.float32)

    with_loss = labels is not None
    grid = (B // tb, Sp // ts)

    in_specs = [
        pl.BlockSpec((tb, ts), lambda b, s: (b, s)),          # input_ids
        pl.BlockSpec((tb, ts, H), lambda b, s: (b, s, 0)),    # embeddings
        pl.BlockSpec((H, H), lambda b, s: (0, 0)),            # dense weight
        pl.BlockSpec((1, H), lambda b, s: (0, 0)),            # dense bias
        pl.BlockSpec((H, C), lambda b, s: (0, 0)),            # cls weight
        pl.BlockSpec((1, C), lambda b, s: (0, 0)),            # cls bias
    ]
    inputs = [input_ids, emb, wd, bd, wc, bc]
    out_shape = [jax.ShapeDtypeStruct((B, C), jnp.float32)]
    out_specs = [pl.BlockSpec((tb, C), lambda b, s: (b, 0))]

    if with_loss:
        labels2 = labels.astype(jnp.float32).reshape(B, 1)
        in_specs.append(pl.BlockSpec((tb, 1), lambda b, s: (b, 0)))
        inputs.append(labels2)
        out_shape.append(jax.ShapeDtypeStruct((B, 1), jnp.float32))
        out_specs.append(pl.BlockSpec((tb, 1), lambda b, s: (b, 0)))

    outs = pl.pallas_call(
        _make_linevul_kernel(with_loss),
        out_shape=tuple(out_shape),
        grid_spec=pltpu.PrefetchScalarGridSpec(
            num_scalar_prefetch=0,
            grid=grid,
            in_specs=in_specs,
            out_specs=tuple(out_specs),
            scratch_shapes=[pltpu.VMEM((tb, H), jnp.float32),   # pooled sum
                            pltpu.VMEM((tb, 1), jnp.float32)],  # mask denom
        ),
        compiler_params=pltpu.CompilerParams(
            dimension_semantics=("parallel", "arbitrary"),
            vmem_limit_bytes=vmem_limit_bytes),
    )(*inputs)

    prob = outs[0]
    if with_loss:
        ll = outs[1]                                   # [B, 1] per-row ll
        return -jnp.mean(ll), prob
    return prob


def reference_forward(input_ids, labels, emb_table, w_dense, b_dense,
                      w_cls, b_cls, stream_dtype=jnp.bfloat16):
    """Pure-JAX reference with the same dtype policy (bf16 stream, f32 math)."""
    mask = (input_ids != 1).astype(jnp.float32)
    emb = jnp.take(emb_table.astype(stream_dtype), input_ids,
                   axis=0).astype(jnp.float32)
    pooled = jnp.sum(emb * mask[:, :, None], axis=1) / jnp.maximum(
        jnp.sum(mask, axis=1, keepdims=True), 1.0)
    h = jnp.tanh(jnp.dot(pooled.astype(stream_dtype),
                         w_dense.astype(stream_dtype),
                         preferred_element_type=jnp.float32) + b_dense)
    logits = jnp.dot(h.astype(stream_dtype), w_cls.astype(stream_dtype),
                     preferred_element_type=jnp.float32) + b_cls
    prob = jax.nn.sigmoid(logits)
    if labels is None:
        return prob
    y = labels.astype(jnp.float32)
    ll = (jnp.log(prob[:, 0] + 1e-10) * y
          + jnp.log((1.0 - prob)[:, 0] + 1e-10) * (1.0 - y))
    return -jnp.mean(ll), prob


if __name__ == "__main__":
    B, S, H, V, C = 2, 8, 32, 64, 2

    key = jax.random.PRNGKey(0)
    k_ids, k_emb, k_wd, k_bd, k_wc, k_bc = jax.random.split(key, 6)

    input_ids = jax.random.randint(k_ids, (B, S), 0, V, dtype=jnp.int32)
    # ensure at least one non-pad token per row (pad id == 1)
    input_ids = input_ids.at[:, 0].set(5)
    labels = jnp.array([0, 1], dtype=jnp.int32)

    emb_table = 0.1 * jax.random.normal(k_emb, (V, H), jnp.float32)
    w_dense = 0.1 * jax.random.normal(k_wd, (H, H), jnp.float32)
    b_dense = 0.1 * jax.random.normal(k_bd, (H,), jnp.float32)
    w_cls = 0.1 * jax.random.normal(k_wc, (H, C), jnp.float32)
    b_cls = 0.1 * jax.random.normal(k_bc, (C,), jnp.float32)

    # training-style call: (loss, prob)
    loss, prob = linevul_forward(input_ids, labels, emb_table, w_dense,
                                 b_dense, w_cls, b_cls)
    jax.block_until_ready((loss, prob))

    ref_loss, ref_prob = reference_forward(input_ids, labels, emb_table,
                                           w_dense, b_dense, w_cls, b_cls)

    assert jnp.allclose(prob, ref_prob, atol=2e-3), (prob, ref_prob)
    assert jnp.allclose(loss, ref_loss, atol=2e-3), (loss, ref_loss)

    # inference-style call (labels=None): prob only, no loss epilogue
    prob_only = linevul_forward(input_ids, None, emb_table, w_dense, b_dense,
                                w_cls, b_cls)
    jax.block_until_ready(prob_only)
    assert jnp.allclose(prob_only, ref_prob, atol=2e-3)

    print("KERNEL_OK")
</pallas_src>

<mosaic_0001>
module attributes {stable_mosaic.version = 11 : i64} {
  func.func @kernel(%arg0: i32, %arg1: i32, %arg2: memref<2x8xi32, #tpu.memory_space<vmem>>, %arg3: memref<2x8x32xbf16, #tpu.memory_space<vmem>>, %arg4: memref<32x32xbf16, #tpu.memory_space<vmem>>, %arg5: memref<1x32xf32, #tpu.memory_space<vmem>>, %arg6: memref<32x2xbf16, #tpu.memory_space<vmem>>, %arg7: memref<1x2xf32, #tpu.memory_space<vmem>>, %arg8: memref<2x1xf32, #tpu.memory_space<vmem>>, %arg9: memref<2x2xf32, #tpu.memory_space<vmem>>, %arg10: memref<2x1xf32, #tpu.memory_space<vmem>>, %arg11: memref<2x32xf32, #tpu.memory_space<vmem>>, %arg12: memref<2x1xf32, #tpu.memory_space<vmem>>) attributes {dimension_semantics = [#tpu.dimension_semantics<parallel>, #tpu.dimension_semantics<arbitrary>], iteration_bounds = array<i64: 1, 1>, scalar_prefetch = 0 : i64, scratch_operands = 2 : i64, tpu.core_type = #tpu.core_type<tc>, window_params = [{transform_indices = @transform_0, window_bounds = array<i64: 2, 8>}, {transform_indices = @transform_1, window_bounds = array<i64: 2, 8, 32>}, {pipeline_mode = #tpu.pipeline_mode<synchronous>, transform_indices = @transform_2, window_bounds = array<i64: 32, 32>}, {pipeline_mode = #tpu.pipeline_mode<synchronous>, transform_indices = @transform_3, window_bounds = array<i64: 1, 32>}, {pipeline_mode = #tpu.pipeline_mode<synchronous>, transform_indices = @transform_4, window_bounds = array<i64: 32, 2>}, {pipeline_mode = #tpu.pipeline_mode<synchronous>, transform_indices = @transform_5, window_bounds = array<i64: 1, 2>}, {transform_indices = @transform_6, window_bounds = array<i64: 2, 1>}, {transform_indices = @transform_7, window_bounds = array<i64: 2, 2>}, {transform_indices = @transform_8, window_bounds = array<i64: 2, 1>}]} {
    %c0_i32 = arith.constant 0 : i32
    %0 = arith.cmpi eq, %arg1, %c0_i32 : i32
    %1 = arith.extui %0 : i1 to i32
    %c0_i32_0 = arith.constant 0 : i32
    %2 = arith.cmpi ne, %1, %c0_i32_0 : i32
    scf.if %2 {
      %cst_16 = arith.constant 0.000000e+00 : f32
      %24 = vector.broadcast %cst_16 : f32 to vector<2x32xf32>
      %c0_17 = arith.constant 0 : index
      %c0_18 = arith.constant 0 : index
      %25 = vector.load %arg11[%c0_17, %c0_18] : memref<2x32xf32, #tpu.memory_space<vmem>>, vector<2x32xf32>
      tpu.vector_store %arg11[%c0_17, %c0_18], %24 {strides = array<i32>} : memref<2x32xf32, #tpu.memory_space<vmem>>, vector<2x32xf32>,
      %cst_19 = arith.constant 0.000000e+00 : f32
      %26 = vector.broadcast %cst_19 : f32 to vector<2x1xf32>
      %c0_20 = arith.constant 0 : index
      %c0_21 = arith.constant 0 : index
      %27 = vector.load %arg12[%c0_20, %c0_21] : memref<2x1xf32, #tpu.memory_space<vmem>>, vector<2x1xf32>
      tpu.vector_store %arg12[%c0_20, %c0_21], %26 {strides = array<i32>} : memref<2x1xf32, #tpu.memory_space<vmem>>, vector<2x1xf32>,
    } else {
    }
    %c0 = arith.constant 0 : index
    %c0_1 = arith.constant 0 : index
    %3 = vector.load %arg2[%c0, %c0_1] : memref<2x8xi32, #tpu.memory_space<vmem>>, vector<2x8xi32>
    %c1_i32 = arith.constant 1 : i32
    %4 = vector.broadcast %c1_i32 : i32 to vector<2x8xi32>
    %5 = arith.cmpi ne, %3, %4 : vector<2x8xi32>
    %6 = arith.extui %5 : vector<2x8xi1> to vector<2x8xi32>
    %7 = arith.sitofp %6 : vector<2x8xi32> to vector<2x8xf32>
    %c0_2 = arith.constant 0 : index
    %c0_3 = arith.constant 0 : index
    %c0_4 = arith.constant 0 : index
    %8 = vector.load %arg3[%c0_2, %c0_3, %c0_4] : memref<2x8x32xbf16, #tpu.memory_space<vmem>>, vector<2x8x32xbf16>
    %9 = arith.truncf %7 : vector<2x8xf32> to vector<2x8xbf16>
    %10 = vector.shape_cast %9 : vector<2x8xbf16> to vector<2x1x8xbf16>
    "tpu.trace_start"() <{level = 10 : i32, message = "bqs,bsh->bqh"}> : () -> ()
    %cst = arith.constant dense<0.000000e+00> : vector<2x1x32xf32>
    %11 = tpu.matmul %10, %8, %cst {dimension_numbers = #tpu.dot_dimension_numbers<[2], [1], [1], [2], [0, 0, 0, 1, 1, 2], [0], [0]>} : vector<2x1x8xbf16>, vector<2x8x32xbf16>, vector<2x1x32xf32> -> vector<2x1x32xf32>
    "tpu.trace_stop"() : () -> ()
    %c0_5 = arith.constant 0 : index
    %c0_6 = arith.constant 0 : index
    %12 = vector.load %arg11[%c0_5, %c0_6] : memref<2x32xf32, #tpu.memory_space<vmem>>, vector<2x32xf32>
    %13 = vector.shape_cast %11 : vector<2x1x32xf32> to vector<2x32xf32>
    %14 = arith.addf %12, %13 : vector<2x32xf32>
    %c0_7 = arith.constant 0 : index
    %c0_8 = arith.constant 0 : index
    %15 = vector.load %arg11[%c0_7, %c0_8] : memref<2x32xf32, #tpu.memory_space<vmem>>, vector<2x32xf32>
    tpu.vector_store %arg11[%c0_7, %c0_8], %14 {strides = array<i32>} : memref<2x32xf32, #tpu.memory_space<vmem>>, vector<2x32xf32>,
    %c0_9 = arith.constant 0 : index
    %c0_10 = arith.constant 0 : index
    %16 = vector.load %arg12[%c0_9, %c0_10] : memref<2x1xf32, #tpu.memory_space<vmem>>, vector<2x1xf32>
    %cst_11 = arith.constant dense<0.000000e+00> : vector<2xf32>
    %17 = vector.multi_reduction <add>, %7, %cst_11 [1] : vector<2x8xf32> to vector<2xf32>
    %18 = vector.shape_cast %17 : vector<2xf32> to vector<2x1xf32>
    %19 = arith.addf %16, %18 : vector<2x1xf32>
    %c0_12 = arith.constant 0 : index
    %c0_13 = arith.constant 0 : index
    %20 = vector.load %arg12[%c0_12, %c0_13] : memref<2x1xf32, #tpu.memory_space<vmem>>, vector<2x1xf32>
    tpu.vector_store %arg12[%c0_12, %c0_13], %19 {strides = array<i32>} : memref<2x1xf32, #tpu.memory_space<vmem>>, vector<2x1xf32>,
    %c0_i32_14 = arith.constant 0 : i32
    %21 = arith.cmpi eq, %arg1, %c0_i32_14 : i32
    %22 = arith.extui %21 : i1 to i32
    %c0_i32_15 = arith.constant 0 : i32
    %23 = arith.cmpi ne, %22, %c0_i32_15 : i32
    scf.if %23 {
      %c0_16 = arith.constant 0 : index
      %c0_17 = arith.constant 0 : index
      %24 = vector.load %arg12[%c0_16, %c0_17] : memref<2x1xf32, #tpu.memory_space<vmem>>, vector<2x1xf32>
      %cst_18 = arith.constant 1.000000e+00 : f32
      %25 = vector.broadcast %cst_18 : f32 to vector<2x1xf32>
      %26 = arith.maximumf %24, %25 : vector<2x1xf32>
      %c0_19 = arith.constant 0 : index
      %c0_20 = arith.constant 0 : index
      %27 = vector.load %arg11[%c0_19, %c0_20] : memref<2x32xf32, #tpu.memory_space<vmem>>, vector<2x32xf32>
      %28 = vector.broadcast %26 : vector<2x1xf32> to vector<2x32xf32>
      %29 = arith.divf %27, %28 : vector<2x32xf32>
      %30 = arith.truncf %29 : vector<2x32xf32> to vector<2x32xbf16>
      %c0_21 = arith.constant 0 : index
      %c0_22 = arith.constant 0 : index
      %31 = vector.load %arg4[%c0_21, %c0_22] : memref<32x32xbf16, #tpu.memory_space<vmem>>, vector<32x32xbf16>
      %cst_23 = arith.constant dense<0.000000e+00> : vector<2x32xf32>
      %32 = tpu.matmul %30, %31, %cst_23 {dimension_numbers = #tpu.dot_dimension_numbers<[1], [0], [0], [1], [0, 0, 1, 1], [], []>} : vector<2x32xbf16>, vector<32x32xbf16>, vector<2x32xf32> -> vector<2x32xf32>
      %c0_24 = arith.constant 0 : index
      %c0_25 = arith.constant 0 : index
      %33 = vector.load %arg5[%c0_24, %c0_25] : memref<1x32xf32, #tpu.memory_space<vmem>>, vector<1x32xf32>
      %34 = vector.broadcast %33 : vector<1x32xf32> to vector<2x32xf32>
      %35 = arith.addf %32, %34 : vector<2x32xf32>
      %36 = math.tanh %35 : vector<2x32xf32>
      %37 = arith.truncf %36 : vector<2x32xf32> to vector<2x32xbf16>
      %c0_26 = arith.constant 0 : index
      %c0_27 = arith.constant 0 : index
      %38 = vector.load %arg6[%c0_26, %c0_27] : memref<32x2xbf16, #tpu.memory_space<vmem>>, vector<32x2xbf16>
      %cst_28 = arith.constant dense<0.000000e+00> : vector<2x2xf32>
      %39 = tpu.matmul %37, %38, %cst_28 {dimension_numbers = #tpu.dot_dimension_numbers<[1], [0], [0], [1], [0, 0, 1, 1], [], []>} : vector<2x32xbf16>, vector<32x2xbf16>, vector<2x2xf32> -> vector<2x2xf32>
      %c0_29 = arith.constant 0 : index
      %c0_30 = arith.constant 0 : index
      %40 = vector.load %arg7[%c0_29, %c0_30] : memref<1x2xf32, #tpu.memory_space<vmem>>, vector<1x2xf32>
      %41 = vector.broadcast %40 : vector<1x2xf32> to vector<2x2xf32>
      %42 = arith.addf %39, %41 : vector<2x2xf32>
      %43 = arith.negf %42 : vector<2x2xf32>
      %44 = math.exp %43 : vector<2x2xf32>
      %cst_31 = arith.constant 1.000000e+00 : f32
      %45 = vector.broadcast %cst_31 : f32 to vector<2x2xf32>
      %46 = arith.addf %45, %44 : vector<2x2xf32>
      %47 = arith.divf %45, %46 : vector<2x2xf32>
      %c0_32 = arith.constant 0 : index
      %c0_33 = arith.constant 0 : index
      %48 = vector.load %arg9[%c0_32, %c0_33] : memref<2x2xf32, #tpu.memory_space<vmem>>, vector<2x2xf32>
      tpu.vector_store %arg9[%c0_32, %c0_33], %47 {strides = array<i32>} : memref<2x2xf32, #tpu.memory_space<vmem>>, vector<2x2xf32>,
      %c0_34 = arith.constant 0 : index
      %c0_35 = arith.constant 0 : index
      %49 = vector.load %arg8[%c0_34, %c0_35] : memref<2x1xf32, #tpu.memory_space<vmem>>, vector<2x1xf32>
      %50 = vector.extract_strided_slice %47 {offsets = [0, 0], sizes = [2, 1], strides = [1, 1]} : vector<2x2xf32> to vector<2x1xf32>
      %cst_36 = arith.constant 1.000000e-10 : f32
      %51 = vector.broadcast %cst_36 : f32 to vector<2x1xf32>
      %52 = arith.addf %50, %51 : vector<2x1xf32>
      %53 = math.log %52 : vector<2x1xf32>
      %54 = arith.mulf %53, %49 : vector<2x1xf32>
      %cst_37 = arith.constant 1.000000e+00 : f32
      %55 = vector.broadcast %cst_37 : f32 to vector<2x1xf32>
      %56 = arith.subf %55, %50 : vector<2x1xf32>
      %cst_38 = arith.constant 1.000000e-10 : f32
      %57 = vector.broadcast %cst_38 : f32 to vector<2x1xf32>
      %58 = arith.addf %56, %57 : vector<2x1xf32>
      %59 = math.log %58 : vector<2x1xf32>
      %cst_39 = arith.constant 1.000000e+00 : f32
      %60 = vector.broadcast %cst_39 : f32 to vector<2x1xf32>
      %61 = arith.subf %60, %49 : vector<2x1xf32>
      %62 = arith.mulf %59, %61 : vector<2x1xf32>
      %63 = arith.addf %54, %62 : vector<2x1xf32>
      %c0_40 = arith.constant 0 : index
      %c0_41 = arith.constant 0 : index
      %64 = vector.load %arg10[%c0_40, %c0_41] : memref<2x1xf32, #tpu.memory_space<vmem>>, vector<2x1xf32>
      tpu.vector_store %arg10[%c0_40, %c0_41], %63 {strides = array<i32>} : memref<2x1xf32, #tpu.memory_space<vmem>>, vector<2x1xf32>,
    } else {
    }
    return
  }
  func.func @transform_0(%arg0: i32, %arg1: i32) -> (i32, i32) {
    %c0_i32 = arith.constant 0 : i32
    return %arg0, %arg1 : i32, i32
  }
  func.func @transform_1(%arg0: i32, %arg1: i32) -> (i32, i32, i32) {
    %c0_i32 = arith.constant 0 : i32
    %c0_i32_0 = arith.constant 0 : i32
    return %arg0, %arg1, %c0_i32 : i32, i32, i32
  }
  func.func @transform_2(%arg0: i32, %arg1: i32) -> (i32, i32) {
    %c0_i32 = arith.constant 0 : i32
    %c0_i32_0 = arith.constant 0 : i32
    %c0_i32_1 = arith.constant 0 : i32
    return %c0_i32, %c0_i32_0 : i32, i32
  }
  func.func @transform_3(%arg0: i32, %arg1: i32) -> (i32, i32) {
    %c0_i32 = arith.constant 0 : i32
    %c0_i32_0 = arith.constant 0 : i32
    %c0_i32_1 = arith.constant 0 : i32
    return %c0_i32, %c0_i32_0 : i32, i32
  }
  func.func @transform_4(%arg0: i32, %arg1: i32) -> (i32, i32) {
    %c0_i32 = arith.constant 0 : i32
    %c0_i32_0 = arith.constant 0 : i32
    %c0_i32_1 = arith.constant 0 : i32
    return %c0_i32, %c0_i32_0 : i32, i32
  }
  func.func @transform_5(%arg0: i32, %arg1: i32) -> (i32, i32) {
    %c0_i32 = arith.constant 0 : i32
    %c0_i32_0 = arith.constant 0 : i32
    %c0_i32_1 = arith.constant 0 : i32
    return %c0_i32, %c0_i32_0 : i32, i32
  }
  func.func @transform_6(%arg0: i32, %arg1: i32) -> (i32, i32) {
    %c0_i32 = arith.constant 0 : i32
    %c0_i32_0 = arith.constant 0 : i32
    return %arg0, %c0_i32 : i32, i32
  }
  func.func @transform_7(%arg0: i32, %arg1: i32) -> (i32, i32) {
    %c0_i32 = arith.constant 0 : i32
    %c0_i32_0 = arith.constant 0 : i32
    return %arg0, %c0_i32 : i32, i32
  }
  func.func @transform_8(%arg0: i32, %arg1: i32) -> (i32, i32) {
    %c0_i32 = arith.constant 0 : i32
    %c0_i32_0 = arith.constant 0 : i32
    return %arg0, %c0_i32 : i32, i32
  }
}

</mosaic_0001>

<bundles_post_ra>
// kernel: tpu_custom_call.1
= control target key start
LH: loop header
LB: loop body
LE: loop exit
PB: predicated region body
PF: predicated region fallthrough
CT: control target
= control target key end

     0   :  { %v49_v1 = vlaneseq  ;;  %vm177_vm0 = vcmask 58368   ;;  %v469_v2 = vmov 1966171168   ;;  %v470_v4 = vmov 0.0   ;;  %s588_s0 = inlined_call_operand.vmem [shape: s32[2,8], index: 0, kind: input, shape index: {}]   ;;  %s589_s1 = inlined_call_operand.vmem [shape: bf16[2,8,32], index: 1, kind: input, shape index: {}]   ;;  %s590_s2 = inlined_call_operand.vmem [shape: bf16[32,32], index: 2, kind: input, shape index: {}]   ;;  %s591_s3 = inlined_call_operand.vmem [shape: f32[1,32], index: 3, kind: input, shape index: {}]   ;;  %s592_s4 = inlined_call_operand.vmem [shape: bf16[32,2], index: 4, kind: input, shape index: {}]   ;;  %s593_s5 = inlined_call_operand.vmem [shape: f32[1,2], index: 5, kind: input, shape index: {}]   ;;  %s594_s6 = inlined_call_operand.vmem [shape: f32[2,1], index: 6, kind: input, shape index: {}]   ;;  %s595_s7 = inlined_call_operand.hbm [shape: f32[2,2], index: 7, kind: output, shape index: {0}]   ;;  %s596_s8 = inlined_call_operand.vmem [shape: f32[2,1], index: 8, kind: output, shape index: {1}]  }
   0x1   :  { %v38_v0 = vld [vmem:[%s588_s0] sm:$0x3]  ;;  %v47_v3 = vunpack.c.l.s4 %v469_v2  ;;  %401 = vmatprep.subr.bf16.mxu1 %v470_v4  ;;  %v43_v5 = vld [vmem:[%s589_s1 + $0x4] sm:$0xf]  ;;  %vm71_vm2 = vcmask 1043456   ;;  %395 = vmatprep.subr.bf16.mxu0 %v470_v4  ;;  %vm471_vm3 = vmmov 0  }
   0x2   :  { %vm39_vm1 = vcmp.ne.s32.totalorder %v38_v0, 1  ;;  %v42_v6 = vld [vmem:[%s589_s1] sm:$0xf]  ;;  %v50_v8 = vshrl.u32 %v49_v1, 7  ;;  %v124_v9 = vsel %vm71_vm2, %v43_v5, 0  ;;  %403 = vmatprep.mubr.msk.bf16.mxu1 %vm471_vm3, %v470_v4  ;;  %vm36_vm4 = vcmask 1024   ;;  %397 = vmatprep.mubr.msk.bf16.mxu0 %vm471_vm3, %v470_v4 }
   0x3   :  { %v372_v7 = vsel %vm39_vm1, 1.0, %v470_v4  ;;  %v73_v10 = vsel %vm71_vm2, %v42_v6, 0  ;;  %v48_v11 = vunpack.c.0.s8 %v47_v3  ;;  %402 = vmatpush3.bf16.msra.mxu1 %v124_v9  ;;  %37 = vst.msk [vmem:[#allocation3] sm:$0x3] %vm36_vm4, %v470_v4 }
   0x4   :  { %v178_v12 = vsel %vm177_vm0, %v372_v7, 0.0  ;;  %v44_v13 = vpack.c.bf16 %v372_v7, %v372_v7  ;;  %396 = vmatpush3.bf16.msra.mxu0 %v73_v10  ;;  %415 = vmatprep.subr.bf16.mxu1 %v470_v4 }
   0x5   :  { %179 = vadd.xlane.f32.xlu0 %v178_v12  ;;  %v51_v14 = vsub.s32 %v48_v11, %v50_v8  ;;  %407 = vmatprep.subr.bf16.mxu0 %v470_v4 }
   0x6   :  { %14 = vsyncpa [#allocation5], 0  ;;  %v65_v19 = vsub.s32 0, %v50_v8  ;;  %vm67_vm5 = vcmask 64512   ;;  %v472_v23 = vmov 0   ;;  %vm34_vm6 = vcmask 254976  }
   0x7   :  { %v52_v15 = vrot.slane %v44_v13, %v51_v14  ;;  %428 = vset.pattern.permute.xlu0 %v472_v23  ;;  %35 = vst.msk [vmem:[#allocation2] sm:$0x3] %vm34_vm6, %v470_v4  ;;  %v429_v29 = vld [vmem:[%s590_s2] sm:$0xff]   ;;  %v430_v30 = vld [vmem:[%s590_s2 + $0x8] sm:$0xff]   ;;  %vm170_vm7 = vcmask 1041409   ;;  %vm221_vm8 = vcmask 261120  }
   0x8   :  { %v431_v48 = vld [vmem:[%s592_s4] sm:$0xff]   ;;  %v432_v49 = vld [vmem:[%s592_s4 + $0x8] sm:$0xff]   ;;  %vm339_vm9 = vcmask 9216  }
   0x9   :  { %v59_v16 = vrot.slane %v52_v15, %v51_v14  ;;  %v376_v50 = vld [vmem:[%s591_s3] ss:$0 sm:$0xff]  ;;  %s473_s3 = smov [#allocation4]  }
   0xa   :  { %v176_v24 = vld [vmem:[#allocation3] sm:$0x3]  ;;  %v380_v58 = vld [vmem:[%s593_s5] ss:$0 sm:$0xff]  ;;  %s360_s4 = sshll.u32 %s473_s3, 4  ;;  %s361_s4 = int_to_ptr.vmem [resolvable:$true] %s360_s4 }
   0xb   :  { %v61_v17 = vunpack.i.h.s16 %v59_v16  ;;  %v373_v18 = vpack.i.b16 %v59_v16, %v59_v16  ;;  %s445_s20 = scalar_lea.vmem %s361_s4, 32  ;;  %p450_p1 = scmp.lt.s32.totalorder %s361_s4, %s361_s4 }
   0xc   :  { %p446_p0 = scmp.ne.s32.totalorder %s361_s4, %s445_s20  ;;  %p451_p2 = scmp.lt.s32.totalorder %s445_s20, %s445_s20 }
   0xd   :  { %v115_v20 = vpack.i.b16 %v61_v17, %v61_v17  ;;  %v66_v21 = vrot.slane %v373_v18, %v65_v19 }
   0xe   :  { %v166_v37 = vld [vmem:[#allocation2] sm:$0x3]  ;;  %p452_p3 = por %p451_p2, %p450_p1 }
   0xf   :  { %v119_v22 = vrot.slane %v115_v20, %v65_v19  ;;  %398 = vmatmul.mubr.msk.bf16.vlgmr.msra.gmra.mrb[0].mxu0 %vm67_vm5, %v66_v21 }
  0x10   :  { %411 = vmatprep.mubr.msk.bf16.mxu0 %vm471_vm3, %v470_v4  ;;  %408 = vmatpush3.bf16.msra.mxu0 %v429_v29  ;;  %p453_p4 = pnand %p452_p3, %p446_p0 }
  0x11   :  { %404 = vmatmul.mubr.msk.bf16.vlgmr.msra.gmra.mrb[0].mxu1 %vm67_vm5, %v119_v22  ;;  %409 = vmatprep.subr.bf16.mxu0 %v470_v4 }
  0x12   :  { %419 = vmatprep.mubr.msk.bf16.mxu1 %vm471_vm3, %v470_v4  ;;  %416 = vmatpush3.bf16.msra.mxu1 %v431_v48 }
  0x13   :  { %417 = vmatprep.subr.bf16.mxu1 %v470_v4 }
  0x14   :  { %410 = vmatpush3.bf16.msra.mxu0 %v430_v30 }
  0x16   :  { %418 = vmatpush3.bf16.msra.mxu1 %v432_v49 }
  0x92   :  { %v180_v25 = vpop.xlane.xlu0 %179 }
  0x93   :  { %v181_v26 = vadd.f32 %v180_v25, %v176_v24 }
  0x95   :  { %183 = vst.msk [vmem:[#allocation3] sm:$0x3] %vm36_vm4, %v181_v26 }
  0x9c   :  { %v187_v27 = vld [vmem:[#allocation3] sm:$0x3] }
  0x9d   :  { %v188_v28 = vmax.f32 %v187_v27, 1.0 }
  0x9f   :  { %192 = vperm.xlu0 %428, %v188_v28  }
  0xe2   :  { %v109_v31 = vpop.f32.mrb[0].mxu0 }
  0xe3   :  { %v399_v32 = vpop.f32.mrb[1].mxu0 }
  0xe4   :  { %v160_v33 = vpop.f32.mrb[0].mxu1  ;;  %v112_v34 = vpop.f32.mrb[2].mxu0 }
  0xe5   :  { %v169_v35 = vrot.slane %v160_v33, 7  ;;  %v405_v36 = vpop.f32.mrb[1].mxu1  ;;  %v400_v38 = vpop.f32.mrb[3].mxu0 }
  0xe6   :  { %v163_v39 = vpop.f32.mrb[2].mxu1 }
  0xe7   :  { %v171_v40 = vsel %vm170_vm7, %v169_v35, %v109_v31  ;;  %v406_v41 = vpop.f32.mrb[3].mxu1 }
  0xe8   :  { %v173_v42 = vadd.f32 %v171_v40, %v166_v37 }
  0xea   :  { %175 = vst.msk [vmem:[#allocation2] sm:$0x3] %vm34_vm6, %v173_v42 }
  0xf1   :  { %v189_v44 = vld [vmem:[#allocation2] sm:$0x3] }
 0x11e   :  { %v193_v43 = vpop.permute.xlu0 %192 }
 0x11f   :  { %433 = vrcp.f32 %v193_v43 }
 0x129   :  { %v434_v45 = vpop.eup %433 }
 0x12a   :  { %v196_v46 = vmul.f32 %v434_v45, %v189_v44 }
 0x12c   :  { %v197_v47 = vpack.c.bf16 %v196_v46, %v196_v46 }
 0x12e   :  { %412 = vmatmul.mubr.msk.bf16.vlgmr.msra.gmra.mrb[4].mxu0 %vm221_vm8, %v197_v47 }
 0x201   :  { %v259_v51 = vpop.f32.mrb[4].mxu0 }
 0x202   :  { %v260_v52 = vadd.f32 %v376_v50, %v259_v51  ;;  %v413_v53 = vpop.f32.mrb[5].mxu0 }
 0x203   :  { %v262_v54 = vpop.f32.mrb[6].mxu0 }
 0x204   :  { %435 = vtanh.f32 %v260_v52  ;;  %v414_v55 = vpop.f32.mrb[7].mxu0 }
 0x20e   :  { %v436_v56 = vpop.eup %435 }
 0x20f   :  { %v266_v57 = vpack.c.bf16 %v436_v56, %v436_v56 }
 0x211   :  { %420 = vmatmul.mubr.msk.bf16.vlgmr.msra.gmra.mrb[4].mxu1 %vm221_vm8, %v266_v57 }
 0x2e4   :  { %v327_v59 = vpop.f32.mrb[4].mxu1 }
 0x2e5   :  { %v328_v60 = vadd.f32 %v380_v58, %v327_v59  ;;  %v421_v61 = vpop.f32.mrb[5].mxu1 }
 0x2e6   :  { %v330_v62 = vpop.f32.mrb[6].mxu1 }
 0x2e7   :  { %v384_v63 = vmul.f32 -1.442695, %v328_v60  ;;  %v422_v0 = vpop.f32.mrb[7].mxu1 }
 0x2e9   :  { %437 = vpow2.f32 %v384_v63 }
 0x2f3   :  { %v438_v1 = vpop.eup %437 }
 0x2f4   :  { %v336_v2 = vadd.f32 1.0, %v438_v1 }
 0x2f6   :  { %439 = vrcp.f32 %v336_v2 }
 0x300   :  { %v440_v3 = vpop.eup %439 }
 0x301   :  { %v342_v4 = vadd.f32 1e-10, %v440_v3  ;;  %v346_v5 = vsub.f32 1.0, %v440_v3  ;;  %340 = vst.msk [vmem:[#allocation4] sm:$0x3] %vm339_vm9, %v440_v3 }
 0x302   :  { %456 = shalt.err (!%p453_p4)
}
 0x303   :  { %s457_s22 = scalar_lea.hbm %s595_s7, 32 }
 0x304   :  { %p458_p5 = scmp.ne.s32.totalorder %s595_s7, %s457_s22  ;;  %p461_p6 = scmp.lt.u32.totalorder %s457_s22, %s595_s7 }
 0x306   :  { %p463_p7 = pnand %p461_p6, %p458_p5 }
 0x308   :  { %466 = shalt.err (!%p463_p7)
}
 0x309   :  { %363 = dma.vmem_to_hbm [thread:$0]  %s361_s4, 32, %s595_s7, [#allocation5]   ;;  %441 = vlog2.f32 %v342_v4  ;;  %v347_v6 = vadd.f32 1e-10, %v346_v5  ;;  %v341_v7 = vld [vmem:[%s594_s6] sm:$0x3] }
 0x30a   :  { %v350_v10 = vsub.f32 1.0, %v341_v7 }
 0x30b   :  { %443 = vlog2.f32 %v347_v6 }
 0x313   :  { %v442_v8 = vpop.eup %441 }
 0x314   :  { %v344_v9 = vmul.f32 0.6931472, %v442_v8 }
 0x315   :  { %v444_v11 = vpop.eup %443 }
 0x316   :  { %v349_v12 = vmul.f32 0.6931472, %v444_v11  ;;  %v345_v13 = vmul.f32 %v344_v9, %v341_v7 }
 0x318   :  { %v351_v14 = vmul.f32 %v350_v10, %v349_v12 }
 0x31a   :  { %v352_v15 = vadd.f32 %v351_v14, %v345_v13 }
 0x31c   :  { %353 = vst.msk [vmem:[%s596_s8] sm:$0x3] %vm36_vm4, %v352_v15 }
 0x31d   :  { %467 = dma.done.wait [#allocation5], 32  }
 0x31e   :  { %468 = vsyncadd [#allocation5], 4294967264 }
 0x31f   :  { %371 = vsyncpa [#allocation5], 1 }

</bundles_post_ra>
